<compile_context>
chip_gen: v7x
topology: tpu7x:2x2x1
jax: 0.10.0
libtpu: 0.0.40
codegen_flags: <defaults>
</compile_context>

<pallas_src>
from functools import partial

import jax
import jax.numpy as jnp
from jax.experimental import pallas as pl
from jax.experimental.pallas import tpu as pltpu


def _round_up(x: int, m: int) -> int:
    return ((x + m - 1) // m) * m


def simple_nn_kernel(x_ref, w1_ref, b1_ref, w2_ref, b2_ref, o_ref):
    # fc1 on the MXU: cast x to bf16 in-kernel (free on the VPU), f32 accumulate.
    x = x_ref[...].astype(jnp.bfloat16)
    h = jnp.dot(x, w1_ref[...], preferred_element_type=jnp.float32)
    h = jnp.maximum(h + b1_ref[...], 0.0)                  # bias + ReLU in f32
    # fc2 on the MXU (bf16 activations, f32 accumulate).
    y = jnp.dot(h.astype(jnp.bfloat16), w2_ref[...],
                preferred_element_type=jnp.float32)
    o_ref[...] = (y + b2_ref[...]).astype(o_ref.dtype)     # bias in f32, bf16 store


def prepare_params(w1, b1, w2, b2):
    """One-time: zero-pad feature dims to 128 lanes and cast weights to bf16.

    Zero-padding is value-preserving: padded hidden columns get bias 0 ->
    relu(0)=0, padded w2 rows see zeros, padded output columns are sliced off.
    """
    K, H = w1.shape
    N = w2.shape[1]
    K_pad, H_pad, N_pad = _round_up(K, 128), _round_up(H, 128), _round_up(N, 128)
    w1_p = jnp.pad(w1, ((0, K_pad - K), (0, H_pad - H))).astype(jnp.bfloat16)
    b1_p = jnp.pad(b1, ((0, 0), (0, H_pad - H))).astype(jnp.float32)
    w2_p = jnp.pad(w2, ((0, H_pad - H), (0, N_pad - N))).astype(jnp.bfloat16)
    b2_p = jnp.pad(b2, ((0, 0), (0, N_pad - N))).astype(jnp.float32)
    return w1_p, b1_p, w2_p, b2_p


@partial(jax.jit, static_argnames=("out_features",))
def simple_nn_forward(x, w1_p, b1_p, w2_p, b2_p, *, out_features):
    """y = relu(x @ w1 + b1) @ w2 + b2 (fused Pallas kernel, lane-dense tiles)."""
    B, K = x.shape
    K_pad, H_pad = w1_p.shape
    N_pad = w2_p.shape[1]
    H = b1_p.shape[1]  # padded hidden width (only used for cost bookkeeping)
    N = out_features

    # Batch tiling: single grid step for small B (removes per-step overhead);
    # tm=256 with a "parallel" batch axis only when B is large enough that
    # each TensorCore gets multiple pipeline steps.
    if B <= 512:
        tm_eff = _round_up(B, 8)
        B_pad = tm_eff
    else:
        tm_eff = 256
        B_pad = _round_up(B, tm_eff)
    grid_steps = B_pad // tm_eff
    semantics = ("parallel",) if grid_steps > 1 else ("arbitrary",)

    # Pad x (f32) only if needed; under jit this fuses instead of an extra pass.
    if (B_pad, K_pad) != (B, K):
        x_in = jnp.pad(x, ((0, B_pad - B), (0, K_pad - K)))
    else:
        x_in = x

    # Real (unpadded) work for the advisory cost estimate.
    flops = 2 * B * (K * 100 if False else K * min(H_pad, H_pad))  # placeholder avoided below
    flops = 2 * B * (K * H_pad + H_pad * N)  # conservative real-ish flops
    bytes_accessed = (B * K * 4 + K * H_pad * 2 + H_pad * 4
                      + H_pad * N * 2 + N * 4 + B * N * 2)

    out_padded = pl.pallas_call(
        simple_nn_kernel,
        out_shape=jax.ShapeDtypeStruct((B_pad, N_pad), jnp.bfloat16),
        grid=(grid_steps,),
        in_specs=[
            pl.BlockSpec((tm_eff, K_pad), lambda i: (i, 0)),   # x: tiled on batch, f32
            pl.BlockSpec((K_pad, H_pad), lambda i: (0, 0)),    # w1: VMEM-resident bf16
            pl.BlockSpec((1, H_pad), lambda i: (0, 0)),        # b1: f32
            pl.BlockSpec((H_pad, N_pad), lambda i: (0, 0)),    # w2: VMEM-resident bf16
            pl.BlockSpec((1, N_pad), lambda i: (0, 0)),        # b2: f32
        ],
        out_specs=pl.BlockSpec((tm_eff, N_pad), lambda i: (i, 0)),
        compiler_params=pltpu.CompilerParams(dimension_semantics=semantics),
        cost_estimate=pl.CostEstimate(
            flops=flops, transcendentals=0, bytes_accessed=bytes_accessed),
    )(x_in, w1_p, b1_p, w2_p, b2_p)

    # Slice the real rows/columns and return f32 (fused under jit).
    return out_padded[:B, :N].astype(jnp.float32)


def init_params(key, input_size, hidden_size, output_size):
    # Deterministic init mimicking nn.Linear default (uniform +/- 1/sqrt(fan_in)).
    k1, k2, k3, k4 = jax.random.split(key, 4)
    bound1 = 1.0 / (input_size ** 0.5)
    bound2 = 1.0 / (hidden_size ** 0.5)
    w1 = jax.random.uniform(k1, (input_size, hidden_size), jnp.float32, -bound1, bound1)
    b1 = jax.random.uniform(k2, (1, hidden_size), jnp.float32, -bound1, bound1)
    w2 = jax.random.uniform(k3, (hidden_size, output_size), jnp.float32, -bound2, bound2)
    b2 = jax.random.uniform(k4, (1, output_size), jnp.float32, -bound2, bound2)
    return w1, b1, w2, b2


if __name__ == "__main__":
    # Small shapes consistent with the module: hidden=100, output=6,
    # input_size = stand-in for CountVectorizer vocab (lane-aligned here so no
    # x padding is needed), small batch -> single grid step.
    batch = 8
    input_size = 128   # stand-in for CountVectorizer vocab size
    hidden_size = 100
    output_size = 6

    key = jax.random.PRNGKey(0)
    kx, kp = jax.random.split(key)
    x = jax.random.uniform(kx, (batch, input_size), jnp.float32)  # bag-of-words-like
    w1, b1, w2, b2 = init_params(kp, input_size, hidden_size, output_size)

    # One-time parameter preparation (pad + bf16 cast), hoisted out of forward.
    w1_p, b1_p, w2_p, b2_p = prepare_params(w1, b1, w2, b2)

    out = simple_nn_forward(x, w1_p, b1_p, w2_p, b2_p, out_features=output_size)
    out = jax.block_until_ready(out)
    assert out.shape == (batch, output_size)

    # Reference with matching bf16 matmul operands / f32 accumulation.
    h_ref = jnp.maximum(
        jnp.dot(x.astype(jnp.bfloat16), w1.astype(jnp.bfloat16),
                preferred_element_type=jnp.float32) + b1, 0.0)
    ref = jnp.dot(h_ref.astype(jnp.bfloat16), w2.astype(jnp.bfloat16),
                  preferred_element_type=jnp.float32) + b2
    assert jnp.allclose(out, ref, atol=2e-2, rtol=2e-2)

    # Sanity-check against pure f32 math (looser tolerance; bf16 operands/store).
    ref_f32 = jnp.maximum(x @ w1 + b1, 0.0) @ w2 + b2
    assert jnp.allclose(out, ref_f32, atol=5e-2, rtol=5e-2)

    print("KERNEL_OK")
</pallas_src>

<mosaic_0001>
module attributes {stable_mosaic.version = 11 : i64} {
  func.func @simple_nn_kernel(%arg0: i32, %arg1: memref<8x128xf32, #tpu.memory_space<vmem>>, %arg2: memref<128x128xbf16, #tpu.memory_space<vmem>>, %arg3: memref<1x128xf32, #tpu.memory_space<vmem>>, %arg4: memref<128x128xbf16, #tpu.memory_space<vmem>>, %arg5: memref<1x128xf32, #tpu.memory_space<vmem>>, %arg6: memref<8x128xbf16, #tpu.memory_space<vmem>>) attributes {dimension_semantics = [#tpu.dimension_semantics<arbitrary>], iteration_bounds = array<i64: 1>, scalar_prefetch = 0 : i64, scratch_operands = 0 : i64, tpu.core_type = #tpu.core_type<tc>, window_params = [{transform_indices = @transform_0, window_bounds = array<i64: 8, 128>}, {pipeline_mode = #tpu.pipeline_mode<synchronous>, transform_indices = @transform_1, window_bounds = array<i64: 128, 128>}, {pipeline_mode = #tpu.pipeline_mode<synchronous>, transform_indices = @transform_2, window_bounds = array<i64: 1, 128>}, {pipeline_mode = #tpu.pipeline_mode<synchronous>, transform_indices = @transform_3, window_bounds = array<i64: 128, 128>}, {pipeline_mode = #tpu.pipeline_mode<synchronous>, transform_indices = @transform_4, window_bounds = array<i64: 1, 128>}, {transform_indices = @transform_5, window_bounds = array<i64: 8, 128>}]} {
    %c0 = arith.constant 0 : index
    %c0_0 = arith.constant 0 : index
    %0 = vector.load %arg1[%c0, %c0_0] : memref<8x128xf32, #tpu.memory_space<vmem>>, vector<8x128xf32>
    %1 = arith.truncf %0 : vector<8x128xf32> to vector<8x128xbf16>
    %c0_1 = arith.constant 0 : index
    %c0_2 = arith.constant 0 : index
    %2 = vector.load %arg2[%c0_1, %c0_2] : memref<128x128xbf16, #tpu.memory_space<vmem>>, vector<128x128xbf16>
    %cst = arith.constant dense<0.000000e+00> : vector<8x128xf32>
    %3 = tpu.matmul %1, %2, %cst {dimension_numbers = #tpu.dot_dimension_numbers<[1], [0], [0], [1], [0, 0, 1, 1], [], []>} : vector<8x128xbf16>, vector<128x128xbf16>, vector<8x128xf32> -> vector<8x128xf32>
    %c0_3 = arith.constant 0 : index
    %c0_4 = arith.constant 0 : index
    %4 = vector.load %arg3[%c0_3, %c0_4] : memref<1x128xf32, #tpu.memory_space<vmem>>, vector<1x128xf32>
    %5 = vector.broadcast %4 : vector<1x128xf32> to vector<8x128xf32>
    %6 = arith.addf %3, %5 : vector<8x128xf32>
    %cst_5 = arith.constant 0.000000e+00 : f32
    %7 = vector.broadcast %cst_5 : f32 to vector<8x128xf32>
    %8 = arith.maximumf %6, %7 : vector<8x128xf32>
    %9 = arith.truncf %8 : vector<8x128xf32> to vector<8x128xbf16>
    %c0_6 = arith.constant 0 : index
    %c0_7 = arith.constant 0 : index
    %10 = vector.load %arg4[%c0_6, %c0_7] : memref<128x128xbf16, #tpu.memory_space<vmem>>, vector<128x128xbf16>
    %cst_8 = arith.constant dense<0.000000e+00> : vector<8x128xf32>
    %11 = tpu.matmul %9, %10, %cst_8 {dimension_numbers = #tpu.dot_dimension_numbers<[1], [0], [0], [1], [0, 0, 1, 1], [], []>} : vector<8x128xbf16>, vector<128x128xbf16>, vector<8x128xf32> -> vector<8x128xf32>
    %c0_9 = arith.constant 0 : index
    %c0_10 = arith.constant 0 : index
    %12 = vector.load %arg5[%c0_9, %c0_10] : memref<1x128xf32, #tpu.memory_space<vmem>>, vector<1x128xf32>
    %13 = vector.broadcast %12 : vector<1x128xf32> to vector<8x128xf32>
    %14 = arith.addf %11, %13 : vector<8x128xf32>
    %15 = arith.truncf %14 : vector<8x128xf32> to vector<8x128xbf16>
    %c0_11 = arith.constant 0 : index
    %c0_12 = arith.constant 0 : index
    %16 = vector.load %arg6[%c0_11, %c0_12] : memref<8x128xbf16, #tpu.memory_space<vmem>>, vector<8x128xbf16>
    tpu.vector_store %arg6[%c0_11, %c0_12], %15 {strides = array<i32>} : memref<8x128xbf16, #tpu.memory_space<vmem>>, vector<8x128xbf16>,
    return
  }
  func.func @transform_0(%arg0: i32) -> (i32, i32) {
    %c0_i32 = arith.constant 0 : i32
    %c0_i32_0 = arith.constant 0 : i32
    return %arg0, %c0_i32 : i32, i32
  }
  func.func @transform_1(%arg0: i32) -> (i32, i32) {
    %c0_i32 = arith.constant 0 : i32
    %c0_i32_0 = arith.constant 0 : i32
    %c0_i32_1 = arith.constant 0 : i32
    return %c0_i32, %c0_i32_0 : i32, i32
  }
  func.func @transform_2(%arg0: i32) -> (i32, i32) {
    %c0_i32 = arith.constant 0 : i32
    %c0_i32_0 = arith.constant 0 : i32
    %c0_i32_1 = arith.constant 0 : i32
    return %c0_i32, %c0_i32_0 : i32, i32
  }
  func.func @transform_3(%arg0: i32) -> (i32, i32) {
    %c0_i32 = arith.constant 0 : i32
    %c0_i32_0 = arith.constant 0 : i32
    %c0_i32_1 = arith.constant 0 : i32
    return %c0_i32, %c0_i32_0 : i32, i32
  }
  func.func @transform_4(%arg0: i32) -> (i32, i32) {
    %c0_i32 = arith.constant 0 : i32
    %c0_i32_0 = arith.constant 0 : i32
    %c0_i32_1 = arith.constant 0 : i32
    return %c0_i32, %c0_i32_0 : i32, i32
  }
  func.func @transform_5(%arg0: i32) -> (i32, i32) {
    %c0_i32 = arith.constant 0 : i32
    %c0_i32_0 = arith.constant 0 : i32
    return %arg0, %c0_i32 : i32, i32
  }
}

</mosaic_0001>

<bundles_post_ra>
// kernel: simple_nn_forward.1
= control target key start
LH: loop header
LB: loop body
LE: loop exit
PB: predicated region body
PF: predicated region fallthrough
CT: control target
= control target key end

     0   :  { %10 = vsyncpa [#allocation3], 0  ;;  %s551_s0 = inlined_call_operand.hbm [shape: f32[8,128], index: 0, kind: input, shape index: {}]   ;;  %s552_s1 = inlined_call_operand.hbm [shape: bf16[128,128], index: 1, kind: input, shape index: {}]   ;;  %s553_s2 = inlined_call_operand.vmem [shape: f32[1,128], index: 2, kind: input, shape index: {}]   ;;  %s554_s3 = inlined_call_operand.hbm [shape: bf16[128,128], index: 3, kind: input, shape index: {}]   ;;  %s555_s4 = inlined_call_operand.vmem [shape: f32[1,128], index: 4, kind: input, shape index: {}]   ;;  %s556_s5 = inlined_call_operand.vmem [shape: bf16[8,128], index: 5, kind: output, shape index: {}]  }
   0x1   :  { %11 = vsyncpa [#allocation5], 0  ;;  %s463_s18 = smov [#allocation4]   ;;  %s393_s22 = scalar_lea.hbm %s552_s1, 1024 }
   0x2   :  { %s27_s19 = sshll.u32 %s463_s18, 4  ;;  %p394_p0 = scmp.ne.s32.totalorder %s552_s1, %s393_s22  ;;  %s28_s19 = int_to_ptr.vmem [resolvable:$true] %s27_s19 }
   0x3   :  { %p397_p1 = scmp.lt.u32.totalorder %s393_s22, %s552_s1 }
   0x5   :  { %p399_p2 = pnand %p397_p1, %p394_p0 }
   0x7   :  { %402 = shalt.err (!%p399_p2)
}
   0x8   :  { %s403_s27 = scalar_lea.vmem %s28_s19, 1024  ;;  %p408_p4 = scmp.lt.s32.totalorder %s28_s19, %s28_s19 }
   0x9   :  { %p404_p3 = scmp.ne.s32.totalorder %s28_s19, %s403_s27  ;;  %p409_p5 = scmp.lt.s32.totalorder %s403_s27, %s403_s27 }
   0xb   :  { %p410_p6 = por %p409_p5, %p408_p4 }
   0xd   :  { %p411_p7 = pnand %p410_p6, %p404_p3 }
   0xf   :  { %414 = shalt.err (!%p411_p7)
}
  0x10   :  { %s464_s28 = smov 64   ;;  %s465_s29 = smov 4  }
  0x11   :  { %33 = dma.hbm_to_vmem [thread:$0]  %s552_s1, 1024, %s28_s19, [#allocation5], %s464_s28, %s464_s28, %s465_s29  }
  0x12   :  { %s466_s7 = smov [#allocation2]   ;;  %s467_s9 = smov [#allocation6]  }
  0x13   :  { %s18_s8 = sshll.u32 %s466_s7, 4  ;;  %s41_s10 = sshll.u32 %s467_s9, 4  ;;  %s19_s8 = int_to_ptr.vmem [resolvable:$true] %s18_s8  ;;  %s42_s10 = int_to_ptr.vmem [resolvable:$true] %s41_s10 }
  0x14   :  { %s415_s13 = scalar_lea.hbm %s551_s0, 128 }
  0x15   :  { %p416_p8 = scmp.ne.s32.totalorder %s551_s0, %s415_s13  ;;  %p419_p9 = scmp.lt.u32.totalorder %s415_s13, %s551_s0 }
  0x17   :  { %p421_p10 = pnand %p419_p9, %p416_p8 }
  0x19   :  { %424 = shalt.err (!%p421_p10)
}
  0x1a   :  { %s425_s1 = scalar_lea.vmem %s19_s8, 128  ;;  %p430_p12 = scmp.lt.s32.totalorder %s19_s8, %s19_s8 }
  0x1b   :  { %p426_p11 = scmp.ne.s32.totalorder %s19_s8, %s425_s1  ;;  %p431_p13 = scmp.lt.s32.totalorder %s425_s1, %s425_s1 }
  0x1d   :  { %p432_p0 = por %p431_p13, %p430_p12 }
  0x1f   :  { %p433_p1 = pnand %p432_p0, %p426_p11 }
  0x21   :  { %436 = shalt.err (!%p433_p1)
}
  0x22   :  { %21 = dma.hbm_to_vmem [thread:$0]  %s551_s0, 128, %s19_s8, [#allocation3]  }
  0x23   :  { %s437_s22 = scalar_lea.hbm %s554_s3, 1024 }
  0x24   :  { %p438_p2 = scmp.ne.s32.totalorder %s554_s3, %s437_s22  ;;  %p441_p3 = scmp.lt.u32.totalorder %s437_s22, %s554_s3 }
  0x26   :  { %p443_p4 = pnand %p441_p3, %p438_p2 }
  0x28   :  { %446 = shalt.err (!%p443_p4)
}
  0x29   :  { %s447_s27 = scalar_lea.vmem %s42_s10, 1024  ;;  %p452_p6 = scmp.lt.s32.totalorder %s42_s10, %s42_s10 }
  0x2a   :  { %p448_p5 = scmp.ne.s32.totalorder %s42_s10, %s447_s27  ;;  %p453_p7 = scmp.lt.s32.totalorder %s447_s27, %s447_s27 }
  0x2c   :  { %p454_p8 = por %p453_p7, %p452_p6 }
  0x2e   :  { %p455_p9 = pnand %p454_p8, %p448_p5 }
  0x30   :  { %458 = shalt.err (!%p455_p9)
}
  0x31   :  { %47 = dma.hbm_to_vmem [thread:$0]  %s554_s3, 1024, %s42_s10, [#allocation5], %s464_s28, %s464_s28, %s465_s29  }
  0x32   :  { %459 = dma.done.wait [#allocation3], 128  }
  0x33   :  { %460 = vsyncadd [#allocation3], 4294967168 }
  0x34   :  { %461 = dma.done.wait [#allocation5], 2048  }
  0x35   :  { %462 = vsyncadd [#allocation5], 4294965248  ;;  %v468_v0 = vmov 0.0   ;;  %vm469_vm0 = vmmov 0   ;;  %v377_v1 = vld [vmem:[#allocation4] sm:$0xff]   ;;  %v378_v2 = vld [vmem:[#allocation4 + $0x8] sm:$0xff]  }
  0x36   :  { %330 = vmatprep.subr.bf16.mxu0 %v468_v0  ;;  %346 = vmatprep.mubr.msk.bf16.mxu0 %vm469_vm0, %v468_v0  ;;  %v379_v3 = vld [vmem:[#allocation4 + $0x10] sm:$0xff]   ;;  %v385_v4 = vld [vmem:[#allocation6] sm:$0xff]   ;;  %v380_v5 = vld [vmem:[#allocation4 + $0x18] sm:$0xff]  }
  0x37   :  { %350 = vmatprep.subr.bf16.mxu1 %v468_v0  ;;  %366 = vmatprep.mubr.msk.bf16.mxu1 %vm469_vm0, %v468_v0  ;;  %v386_v6 = vld [vmem:[#allocation6 + $0x8] sm:$0xff]   ;;  %v381_v7 = vld [vmem:[#allocation4 + $0x20] sm:$0xff]   ;;  %v387_v8 = vld [vmem:[#allocation6 + $0x10] sm:$0xff]  }
  0x38   :  { %331 = vmatpush3.bf16.msra.mxu0 %v377_v1  ;;  %351 = vmatpush3.bf16.msra.mxu1 %v385_v4  ;;  %v382_v9 = vld [vmem:[#allocation4 + $0x28] sm:$0xff]   ;;  %v388_v10 = vld [vmem:[#allocation6 + $0x18] sm:$0xff]   ;;  %v383_v11 = vld [vmem:[#allocation4 + $0x30] sm:$0xff]  }
  0x39   :  { %332 = vmatprep.subr.bf16.mxu0 %v468_v0  ;;  %352 = vmatprep.subr.bf16.mxu1 %v468_v0  ;;  %v389_v12 = vld [vmem:[#allocation6 + $0x20] sm:$0xff]   ;;  %v384_v13 = vld [vmem:[#allocation4 + $0x38] sm:$0xff]   ;;  %v390_v15 = vld [vmem:[#allocation6 + $0x28] sm:$0xff]  }
  0x3a   :  { %v60_v14 = vld [vmem:[#allocation2] sm:$0xff]  ;;  %v391_v17 = vld [vmem:[#allocation6 + $0x30] sm:$0xff]  }
  0x3b   :  { %v61_v16 = vpack.c.bf16 %v60_v14, %v60_v14  ;;  %v392_v18 = vld [vmem:[#allocation6 + $0x38] sm:$0xff]  }
  0x3c   :  { %333 = vmatpush3.bf16.msra.mxu0 %v378_v2  ;;  %353 = vmatpush3.bf16.msra.mxu1 %v386_v6  ;;  %v294_v19 = vld [vmem:[%s553_s2] ss:$0 sm:$0xff] }
  0x3d   :  { %334 = vmatprep.subr.bf16.mxu0 %v468_v0  ;;  %354 = vmatprep.subr.bf16.mxu1 %v468_v0  ;;  %v303_v27 = vld [vmem:[%s555_s4] ss:$0 sm:$0xff] }
  0x40   :  { %335 = vmatpush3.bf16.msra.mxu0 %v379_v3  ;;  %355 = vmatpush3.bf16.msra.mxu1 %v387_v8 }
  0x41   :  { %336 = vmatprep.subr.bf16.mxu0 %v468_v0  ;;  %356 = vmatprep.subr.bf16.mxu1 %v468_v0 }
  0x44   :  { %337 = vmatpush3.bf16.msra.mxu0 %v380_v5  ;;  %357 = vmatpush3.bf16.msra.mxu1 %v388_v10 }
  0x45   :  { %338 = vmatprep.subr.bf16.mxu0 %v468_v0  ;;  %358 = vmatprep.subr.bf16.mxu1 %v468_v0 }
  0x48   :  { %339 = vmatpush3.bf16.msra.mxu0 %v381_v7  ;;  %359 = vmatpush3.bf16.msra.mxu1 %v389_v12 }
  0x49   :  { %340 = vmatprep.subr.bf16.mxu0 %v468_v0  ;;  %360 = vmatprep.subr.bf16.mxu1 %v468_v0 }
  0x4c   :  { %341 = vmatpush3.bf16.msra.mxu0 %v382_v9  ;;  %361 = vmatpush3.bf16.msra.mxu1 %v390_v15 }
  0x4d   :  { %342 = vmatprep.subr.bf16.mxu0 %v468_v0  ;;  %362 = vmatprep.subr.bf16.mxu1 %v468_v0 }
  0x50   :  { %343 = vmatpush3.bf16.msra.mxu0 %v383_v11  ;;  %363 = vmatpush3.bf16.msra.mxu1 %v391_v17 }
  0x51   :  { %344 = vmatprep.subr.bf16.mxu0 %v468_v0  ;;  %364 = vmatprep.subr.bf16.mxu1 %v468_v0 }
  0x54   :  { %345 = vmatpush3.bf16.msra.mxu0 %v384_v13  ;;  %365 = vmatpush3.bf16.msra.mxu1 %v392_v18 }
  0x57   :  { %347 = vmatmul.mubr.bf16.vlgmr.msra.gmra.mrb[0].mxu0 %v61_v16 }
 0x12a   :  { %v167_v20 = vpop.f32.mrb[0].mxu0 }
 0x12b   :  { %v168_v21 = vadd.f32 %v294_v19, %v167_v20  ;;  %v348_v22 = vpop.f32.mrb[1].mxu0 }
 0x12c   :  { %v170_v23 = vpop.f32.mrb[2].mxu0 }
 0x12d   :  { %v173_v24 = vmax.f32 %v168_v21, 0.0  ;;  %v349_v25 = vpop.f32.mrb[3].mxu0 }
 0x12f   :  { %v174_v26 = vpack.c.bf16 %v173_v24, %v173_v24 }
 0x131   :  { %367 = vmatmul.mubr.bf16.vlgmr.msra.gmra.mrb[0].mxu1 %v174_v26 }
 0x204   :  { %v280_v28 = vpop.f32.mrb[0].mxu1 }
 0x205   :  { %v281_v29 = vadd.f32 %v303_v27, %v280_v28  ;;  %v368_v30 = vpop.f32.mrb[1].mxu1 }
 0x206   :  { %v283_v31 = vpop.f32.mrb[2].mxu1 }
 0x207   :  { %v286_v32 = vpack.c.bf16 %v281_v29, %v281_v29  ;;  %v369_v33 = vpop.f32.mrb[3].mxu1 }
 0x209   :  { %287 = vst [vmem:[%s556_s5] sm:$0xf] %v286_v32 }
 0x20a   :  { %292 = vsyncpa [#allocation3], 1 }
 0x20b   :  { %293 = vsyncpa [#allocation5], 1 }

</bundles_post_ra>
